<compile_context>
chip_gen: v5e
topology: v5e:2x2
jax: 0.10.0
libtpu: 0.0.40
codegen_flags: <defaults>
</compile_context>

<pallas_src>
import math
import functools

import jax
import jax.numpy as jnp
from jax.experimental import pallas as pl
from jax.experimental.pallas import tpu as pltpu


def _pick_vmem_limit():
    # ~75% of per-core VMEM: 96 MiB on v5e/v6e (128 MiB), 48 MiB on v7x (64 MiB).
    try:
        cap = int(pltpu.get_tpu_info().vmem_capacity_bytes)
    except Exception:
        return 48 * 1024 * 1024
    return max(32 * 1024 * 1024, min((cap * 3) // 4, 110 * 1024 * 1024))


VMEM_LIMIT = _pick_vmem_limit()


def _pick_tile(total, candidates):
    """Largest candidate that evenly divides `total`; else `total` itself."""
    if total <= candidates[0]:
        return total
    for t in candidates:
        if total % t == 0:
            return t
    return total


# ----------------------------------------------------------------------------
# Kernel 1: multi-head self-attention + residual + LayerNorm
# grid = (batch, query tiles); K/V come from the full sequence each step.
# ----------------------------------------------------------------------------
def attention_kernel(xq_ref, xs_ref, mb_ref,
                     wq_ref, wk_ref, wv_ref, bq_ref, bk_ref, bv_ref,
                     wo_ref, bo_ref, g_ref, beta_ref,
                     o_ref, *, num_heads):
    xq = xq_ref[0]                                # (tq, D) f32 query/residual rows
    xs = xs_ref[0]                                # (S,  D) f32 full sequence (K/V)
    mb = mb_ref[0]                                # (1,  S) f32 additive key-pad bias
    tq, D = xq.shape
    S = xs.shape[0]
    hd = D // num_heads
    scale = 1.0 / math.sqrt(hd)

    xqb = xq.astype(jnp.bfloat16)
    xsb = xs.astype(jnp.bfloat16)

    # Projections: bias-add, scale and bf16 cast immediately so the f32 copies
    # are not kept live alongside the bf16 ones (narrow live ranges).
    qb = ((jnp.dot(xqb, wq_ref[...], preferred_element_type=jnp.float32)
           + bq_ref[...]) * scale).astype(jnp.bfloat16)              # (tq, D)
    kb = (jnp.dot(xsb, wk_ref[...], preferred_element_type=jnp.float32)
          + bk_ref[...]).astype(jnp.bfloat16)                        # (S, D)
    vb = (jnp.dot(xsb, wv_ref[...], preferred_element_type=jnp.float32)
          + bv_ref[...]).astype(jnp.bfloat16)                        # (S, D)

    # Hoisted mask broadcast (emitted once, not once per head).
    mb_full = jnp.broadcast_to(mb, (tq, S))

    # TODO(synk): a fully head-batched 'hqd,hkd->hqk' einsum needs a
    # lane-splitting reshape that Mosaic can reject at small head widths
    # (demo hd=8); the static head loop is kept for compile safety.
    attn = jnp.zeros((tq, D), jnp.float32)
    for h in range(num_heads):
        sl = slice(h * hd, (h + 1) * hd)
        # scores = q_h @ k_h^T via dot_general on the last axes (no relayout).
        s = jax.lax.dot_general(qb[:, sl], kb[:, sl], (((1,), (1,)), ((), ())),
                                preferred_element_type=jnp.float32)  # (tq, S)
        s = s + mb_full
        s = s - jnp.max(s, axis=-1, keepdims=True)
        p = jnp.exp(s)                                               # f32 softmax
        p = p * pl.reciprocal(jnp.sum(p, axis=-1, keepdims=True), approx=True)
        # attn dropout is identity in eval mode
        ctx_h = jnp.dot(p.astype(jnp.bfloat16), vb[:, sl],
                        preferred_element_type=jnp.float32)          # (tq, hd)
        # Per-head output-projection contribution; wo row slice is a cheap
        # sublane slice (hd is a multiple of 8), no lane-offset ctx store.
        attn = attn + jnp.dot(ctx_h.astype(jnp.bfloat16), wo_ref[sl, :],
                              preferred_element_type=jnp.float32)
    attn = attn + bo_ref[...]

    # interacted = LayerNorm(embeddings + attention)   (f32 math)
    y = xq + attn
    mu = jnp.mean(y, axis=-1, keepdims=True)
    var = jnp.mean((y - mu) ** 2, axis=-1, keepdims=True)
    o_ref[0] = (y - mu) * jax.lax.rsqrt(var + 1e-5) * g_ref[...] + beta_ref[...]


def attention_layer(x, mask_bias, blk, num_heads):
    B, S, D = x.shape
    tq = _pick_tile(S, (256, 128))
    nq = S // tq
    kernel = functools.partial(attention_kernel, num_heads=num_heads)

    weight_names = ("wq", "wk", "wv", "bq", "bk", "bv", "wo", "bo", "g", "beta")
    weights = [blk[n] for n in weight_names]

    # TODO(synk): pipeline_mode=pl.Buffered(1) on these grid-invariant weight
    # specs would halve their VMEM footprint; left off for compile safety
    # across JAX versions.
    def full_spec(arr):
        nd = arr.ndim
        return pl.BlockSpec(arr.shape, lambda b, qi, _nd=nd: (0,) * _nd)

    cost = pl.CostEstimate(
        flops=int(B * ((4 + 4 * nq) * S * D * D + 4 * S * S * D)),
        transcendentals=int(B * (num_heads * S * S + S)),
        bytes_accessed=int(sum(w.size * w.dtype.itemsize for w in weights)
                           + (1 + nq) * B * S * D * 4 + B * S * D * 4 + B * S * 4))

    return pl.pallas_call(
        kernel,
        out_shape=jax.ShapeDtypeStruct((B, S, D), jnp.float32),
        grid=(B, nq),
        in_specs=[pl.BlockSpec((1, tq, D), lambda b, qi: (b, qi, 0)),   # query rows
                  pl.BlockSpec((1, S, D), lambda b, qi: (b, 0, 0)),     # full rows (K/V)
                  pl.BlockSpec((1, 1, S), lambda b, qi: (b, 0, 0))]     # key-pad bias
                 + [full_spec(w) for w in weights],
        out_specs=pl.BlockSpec((1, tq, D), lambda b, qi: (b, qi, 0)),
        compiler_params=pltpu.CompilerParams(
            dimension_semantics=("parallel", "parallel"),
            vmem_limit_bytes=VMEM_LIMIT),
        cost_estimate=cost,
    )(x, x, mask_bias, *weights)


# ----------------------------------------------------------------------------
# Kernel 2: MLP (fc1 -> ReLU -> fc2) + residual + LayerNorm on flattened rows.
# Grid = (row tiles,); w1/w2 stay fully VMEM-resident (no HBM re-streaming).
# ----------------------------------------------------------------------------
def mlp_kernel(y_ref, w1_ref, b1_ref, w2_ref, b2_ref, g_ref, beta_ref, o_ref):
    y = y_ref[...]                                         # (tm, D) f32 "interacted"
    h1 = jnp.dot(y.astype(jnp.bfloat16), w1_ref[...],
                 preferred_element_type=jnp.float32) + b1_ref[...]
    h1 = jnp.maximum(h1, 0.0)                              # ReLU; dropout = identity
    z = jnp.dot(h1.astype(jnp.bfloat16), w2_ref[...],
                preferred_element_type=jnp.float32) + b2_ref[...] + y
    mu = jnp.mean(z, axis=-1, keepdims=True)
    var = jnp.mean((z - mu) ** 2, axis=-1, keepdims=True)
    o_ref[...] = (z - mu) * jax.lax.rsqrt(var + 1e-5) * g_ref[...] + beta_ref[...]


def mlp_layer(y, blk):
    BS, D = y.shape
    H4 = blk["w1"].shape[1]
    tm = _pick_tile(BS, (512, 384, 256, 128, 64, 32, 16, 8))

    cost = pl.CostEstimate(
        flops=int(4 * BS * D * H4),
        transcendentals=int(BS),
        bytes_accessed=int(2 * D * H4 * 2 + (H4 + 3 * D) * 4 + 2 * BS * D * 4))

    return pl.pallas_call(
        mlp_kernel,
        out_shape=jax.ShapeDtypeStruct((BS, D), jnp.float32),
        grid=(BS // tm,),
        in_specs=[
            pl.BlockSpec((tm, D), lambda i: (i, 0)),       # interacted rows
            pl.BlockSpec((D, H4), lambda i: (0, 0)),       # w1 resident (bf16)
            pl.BlockSpec((1, H4), lambda i: (0, 0)),       # b1
            pl.BlockSpec((H4, D), lambda i: (0, 0)),       # w2 resident (bf16)
            pl.BlockSpec((1, D), lambda i: (0, 0)),        # b2
            pl.BlockSpec((1, D), lambda i: (0, 0)),        # gamma
            pl.BlockSpec((1, D), lambda i: (0, 0)),        # beta
        ],
        out_specs=pl.BlockSpec((tm, D), lambda i: (i, 0)),
        compiler_params=pltpu.CompilerParams(
            dimension_semantics=("parallel",),
            vmem_limit_bytes=VMEM_LIMIT),
        cost_estimate=cost,
    )(y, blk["w1"], blk["b1"], blk["w2"], blk["b2"], blk["g"], blk["beta"])


# ----------------------------------------------------------------------------
# Classifier head: logits = x_cls @ W + b (weights pre-padded to 128 lanes,
# pre-cast to bf16 once in init_params — no per-call pad/cast plumbing).
# ----------------------------------------------------------------------------
def classifier_kernel(x_ref, w_ref, b_ref, o_ref):
    o_ref[...] = (jnp.dot(x_ref[...].astype(jnp.bfloat16), w_ref[...],
                          preferred_element_type=jnp.float32) + b_ref[...])


def classifier(x_cls, w_padded, b_padded):
    B, D = x_cls.shape
    Cp = w_padded.shape[1]
    return pl.pallas_call(
        classifier_kernel,
        out_shape=jax.ShapeDtypeStruct((B, Cp), jnp.float32),
        compiler_params=pltpu.CompilerParams(vmem_limit_bytes=VMEM_LIMIT),
        cost_estimate=pl.CostEstimate(
            flops=int(2 * B * D * Cp), transcendentals=0,
            bytes_accessed=int((B * D + B * Cp) * 4 + D * Cp * 2)),
    )(x_cls, w_padded, b_padded)


# ----------------------------------------------------------------------------
# Full forward (embedding gather is plain-JAX glue; hot path is Pallas)
# ----------------------------------------------------------------------------
def distilbert_classifier_forward(ids, params, num_heads, num_classes):
    B, S = ids.shape
    D = params["tok_embed"].shape[1]
    # key_padding_mask == (ids == 0), applied as an additive f32 bias
    mask_bias = jnp.where(ids == 0, -1e30, 0.0).astype(jnp.float32).reshape(B, 1, S)

    # DistilBERTEmbedding: tok_embed(seq) + pos_embed(arange(max_len)); dropout=identity
    x = (params["tok_embed"][ids]
         + params["pos_embed"][jnp.arange(S)][None, :, :]).astype(jnp.float32)

    for blk in params["blocks"]:
        interacted = attention_layer(x, mask_bias, blk, num_heads)   # LN(x + MHA(x))
        encoded = mlp_layer(interacted.reshape(B * S, D), blk)       # LN(MLP + interacted)
        x = encoded.reshape(B, S, D)

    x_cls = x[:, 0, :]                                               # [CLS] token
    logits_padded = classifier(x_cls, params["cls_w"], params["cls_b"])
    return logits_padded[:, :num_classes]


# ----------------------------------------------------------------------------
# Deterministic parameter init (shapes follow the torch module's __init__)
# ----------------------------------------------------------------------------
def init_params(key, vocab, max_len, D, n_blocks, C):
    keys = iter(jax.random.split(key, 4 + 8 * n_blocks))

    def nrm(shape, dtype=jnp.float32, scale=0.02):
        return (jax.random.normal(next(keys), shape, jnp.float32) * scale).astype(dtype)

    bf = jnp.bfloat16
    Cp = ((C + 127) // 128) * 128                          # lane-dense classifier width
    cls_w = nrm((D, C))
    params = {
        "tok_embed": nrm((vocab, D)),
        "pos_embed": nrm((max_len, D)),
        # padded + bf16-cast ONCE here, not per forward call
        "cls_w": jnp.zeros((D, Cp), bf).at[:, :C].set(cls_w.astype(bf)),
        "cls_b": jnp.zeros((1, Cp), jnp.float32),
        "blocks": [],
    }
    for _ in range(n_blocks):
        params["blocks"].append({
            # matmul weights in bf16 (MXU), biases / LayerNorm params in f32
            "wq": nrm((D, D), bf), "wk": nrm((D, D), bf), "wv": nrm((D, D), bf),
            "bq": jnp.zeros((1, D), jnp.float32),
            "bk": jnp.zeros((1, D), jnp.float32),
            "bv": jnp.zeros((1, D), jnp.float32),
            "wo": nrm((D, D), bf), "bo": jnp.zeros((1, D), jnp.float32),
            "g": jnp.ones((1, D), jnp.float32),
            "beta": jnp.zeros((1, D), jnp.float32),
            "w1": nrm((D, 4 * D), bf), "b1": jnp.zeros((1, 4 * D), jnp.float32),
            "w2": nrm((4 * D, D), bf), "b2": jnp.zeros((1, D), jnp.float32),
        })
    return params


if __name__ == "__main__":
    # Small shapes consistent with the module:
    # batch=2, seq=max_len=8, embed_dim=32, heads=4, n_layers=4 -> 2 encoder blocks.
    B, S, D, H = 2, 8, 32, 4
    vocab, max_len, n_layers, num_classes = 50, S, 4, 3

    key = jax.random.PRNGKey(0)
    kp, ki = jax.random.split(key)
    params = init_params(kp, vocab, max_len, D, n_layers // 2, num_classes)

    # token ids; id 0 is padding (mask = (x == 0))
    ids = jax.random.randint(ki, (B, S), 1, vocab, dtype=jnp.int32)
    ids = ids.at[1, -2:].set(0)   # exercise the key_padding_mask path

    fwd = jax.jit(functools.partial(distilbert_classifier_forward,
                                    num_heads=H, num_classes=num_classes))
    out = jax.block_until_ready(fwd(ids, params))

    assert out.shape == (B, num_classes)
    assert bool(jnp.all(jnp.isfinite(out)))
    print("KERNEL_OK")
</pallas_src>

<mosaic_0001>
module attributes {stable_mosaic.version = 11 : i64} {
  func.func @mlp_kernel(%arg0: i32, %arg1: memref<16x32xf32, #tpu.memory_space<vmem>>, %arg2: memref<32x128xbf16, #tpu.memory_space<vmem>>, %arg3: memref<1x128xf32, #tpu.memory_space<vmem>>, %arg4: memref<128x32xbf16, #tpu.memory_space<vmem>>, %arg5: memref<1x32xf32, #tpu.memory_space<vmem>>, %arg6: memref<1x32xf32, #tpu.memory_space<vmem>>, %arg7: memref<1x32xf32, #tpu.memory_space<vmem>>, %arg8: memref<16x32xf32, #tpu.memory_space<vmem>>) attributes {dimension_semantics = [#tpu.dimension_semantics<parallel>], iteration_bounds = array<i64: 1>, scalar_prefetch = 0 : i64, scratch_operands = 0 : i64, tpu.core_type = #tpu.core_type<tc>, window_params = [{transform_indices = @transform_0, window_bounds = array<i64: 16, 32>}, {pipeline_mode = #tpu.pipeline_mode<synchronous>, transform_indices = @transform_1, window_bounds = array<i64: 32, 128>}, {pipeline_mode = #tpu.pipeline_mode<synchronous>, transform_indices = @transform_2, window_bounds = array<i64: 1, 128>}, {pipeline_mode = #tpu.pipeline_mode<synchronous>, transform_indices = @transform_3, window_bounds = array<i64: 128, 32>}, {pipeline_mode = #tpu.pipeline_mode<synchronous>, transform_indices = @transform_4, window_bounds = array<i64: 1, 32>}, {pipeline_mode = #tpu.pipeline_mode<synchronous>, transform_indices = @transform_5, window_bounds = array<i64: 1, 32>}, {pipeline_mode = #tpu.pipeline_mode<synchronous>, transform_indices = @transform_6, window_bounds = array<i64: 1, 32>}, {transform_indices = @transform_7, window_bounds = array<i64: 16, 32>}]} {
    %c0 = arith.constant 0 : index
    %c0_0 = arith.constant 0 : index
    %0 = vector.load %arg1[%c0, %c0_0] : memref<16x32xf32, #tpu.memory_space<vmem>>, vector<16x32xf32>
    %1 = arith.truncf %0 : vector<16x32xf32> to vector<16x32xbf16>
    %c0_1 = arith.constant 0 : index
    %c0_2 = arith.constant 0 : index
    %2 = vector.load %arg2[%c0_1, %c0_2] : memref<32x128xbf16, #tpu.memory_space<vmem>>, vector<32x128xbf16>
    %cst = arith.constant dense<0.000000e+00> : vector<16x128xf32>
    %3 = tpu.matmul %1, %2, %cst {dimension_numbers = #tpu.dot_dimension_numbers<[1], [0], [0], [1], [0, 0, 1, 1], [], []>} : vector<16x32xbf16>, vector<32x128xbf16>, vector<16x128xf32> -> vector<16x128xf32>
    %c0_3 = arith.constant 0 : index
    %c0_4 = arith.constant 0 : index
    %4 = vector.load %arg3[%c0_3, %c0_4] : memref<1x128xf32, #tpu.memory_space<vmem>>, vector<1x128xf32>
    %5 = vector.broadcast %4 : vector<1x128xf32> to vector<16x128xf32>
    %6 = arith.addf %3, %5 : vector<16x128xf32>
    %cst_5 = arith.constant 0.000000e+00 : f32
    %7 = vector.broadcast %cst_5 : f32 to vector<16x128xf32>
    %8 = arith.maximumf %6, %7 : vector<16x128xf32>
    %9 = arith.truncf %8 : vector<16x128xf32> to vector<16x128xbf16>
    %c0_6 = arith.constant 0 : index
    %c0_7 = arith.constant 0 : index
    %10 = vector.load %arg4[%c0_6, %c0_7] : memref<128x32xbf16, #tpu.memory_space<vmem>>, vector<128x32xbf16>
    %cst_8 = arith.constant dense<0.000000e+00> : vector<16x32xf32>
    %11 = tpu.matmul %9, %10, %cst_8 {dimension_numbers = #tpu.dot_dimension_numbers<[1], [0], [0], [1], [0, 0, 1, 1], [], []>} : vector<16x128xbf16>, vector<128x32xbf16>, vector<16x32xf32> -> vector<16x32xf32>
    %c0_9 = arith.constant 0 : index
    %c0_10 = arith.constant 0 : index
    %12 = vector.load %arg5[%c0_9, %c0_10] : memref<1x32xf32, #tpu.memory_space<vmem>>, vector<1x32xf32>
    %13 = vector.broadcast %12 : vector<1x32xf32> to vector<16x32xf32>
    %14 = arith.addf %11, %13 : vector<16x32xf32>
    %15 = arith.addf %14, %0 : vector<16x32xf32>
    %cst_11 = arith.constant dense<0.000000e+00> : vector<16xf32>
    %16 = vector.multi_reduction <add>, %15, %cst_11 [1] : vector<16x32xf32> to vector<16xf32>
    %17 = vector.shape_cast %16 : vector<16xf32> to vector<16x1xf32>
    %cst_12 = arith.constant 3.200000e+01 : f32
    %18 = vector.broadcast %cst_12 : f32 to vector<16x1xf32>
    %19 = arith.divf %17, %18 : vector<16x1xf32>
    %20 = vector.broadcast %19 : vector<16x1xf32> to vector<16x32xf32>
    %21 = arith.subf %15, %20 : vector<16x32xf32>
    %22 = arith.mulf %21, %21 : vector<16x32xf32>
    %cst_13 = arith.constant dense<0.000000e+00> : vector<16xf32>
    %23 = vector.multi_reduction <add>, %22, %cst_13 [1] : vector<16x32xf32> to vector<16xf32>
    %24 = vector.shape_cast %23 : vector<16xf32> to vector<16x1xf32>
    %cst_14 = arith.constant 3.200000e+01 : f32
    %25 = vector.broadcast %cst_14 : f32 to vector<16x1xf32>
    %26 = arith.divf %24, %25 : vector<16x1xf32>
    %27 = vector.broadcast %19 : vector<16x1xf32> to vector<16x32xf32>
    %28 = arith.subf %15, %27 : vector<16x32xf32>
    %cst_15 = arith.constant 9.99999974E-6 : f32
    %29 = vector.broadcast %cst_15 : f32 to vector<16x1xf32>
    %30 = arith.addf %26, %29 : vector<16x1xf32>
    %31 = math.rsqrt %30 : vector<16x1xf32>
    %32 = vector.broadcast %31 : vector<16x1xf32> to vector<16x32xf32>
    %33 = arith.mulf %28, %32 : vector<16x32xf32>
    %c0_16 = arith.constant 0 : index
    %c0_17 = arith.constant 0 : index
    %34 = vector.load %arg6[%c0_16, %c0_17] : memref<1x32xf32, #tpu.memory_space<vmem>>, vector<1x32xf32>
    %35 = vector.broadcast %34 : vector<1x32xf32> to vector<16x32xf32>
    %36 = arith.mulf %33, %35 : vector<16x32xf32>
    %c0_18 = arith.constant 0 : index
    %c0_19 = arith.constant 0 : index
    %37 = vector.load %arg7[%c0_18, %c0_19] : memref<1x32xf32, #tpu.memory_space<vmem>>, vector<1x32xf32>
    %38 = vector.broadcast %37 : vector<1x32xf32> to vector<16x32xf32>
    %39 = arith.addf %36, %38 : vector<16x32xf32>
    %c0_20 = arith.constant 0 : index
    %c0_21 = arith.constant 0 : index
    %40 = vector.load %arg8[%c0_20, %c0_21] : memref<16x32xf32, #tpu.memory_space<vmem>>, vector<16x32xf32>
    tpu.vector_store %arg8[%c0_20, %c0_21], %39 {strides = array<i32>} : memref<16x32xf32, #tpu.memory_space<vmem>>, vector<16x32xf32>,
    return
  }
  func.func @transform_0(%arg0: i32) -> (i32, i32) {
    %c0_i32 = arith.constant 0 : i32
    %c0_i32_0 = arith.constant 0 : i32
    return %arg0, %c0_i32 : i32, i32
  }
  func.func @transform_1(%arg0: i32) -> (i32, i32) {
    %c0_i32 = arith.constant 0 : i32
    %c0_i32_0 = arith.constant 0 : i32
    %c0_i32_1 = arith.constant 0 : i32
    return %c0_i32, %c0_i32_0 : i32, i32
  }
  func.func @transform_2(%arg0: i32) -> (i32, i32) {
    %c0_i32 = arith.constant 0 : i32
    %c0_i32_0 = arith.constant 0 : i32
    %c0_i32_1 = arith.constant 0 : i32
    return %c0_i32, %c0_i32_0 : i32, i32
  }
  func.func @transform_3(%arg0: i32) -> (i32, i32) {
    %c0_i32 = arith.constant 0 : i32
    %c0_i32_0 = arith.constant 0 : i32
    %c0_i32_1 = arith.constant 0 : i32
    return %c0_i32, %c0_i32_0 : i32, i32
  }
  func.func @transform_4(%arg0: i32) -> (i32, i32) {
    %c0_i32 = arith.constant 0 : i32
    %c0_i32_0 = arith.constant 0 : i32
    %c0_i32_1 = arith.constant 0 : i32
    return %c0_i32, %c0_i32_0 : i32, i32
  }
  func.func @transform_5(%arg0: i32) -> (i32, i32) {
    %c0_i32 = arith.constant 0 : i32
    %c0_i32_0 = arith.constant 0 : i32
    %c0_i32_1 = arith.constant 0 : i32
    return %c0_i32, %c0_i32_0 : i32, i32
  }
  func.func @transform_6(%arg0: i32) -> (i32, i32) {
    %c0_i32 = arith.constant 0 : i32
    %c0_i32_0 = arith.constant 0 : i32
    %c0_i32_1 = arith.constant 0 : i32
    return %c0_i32, %c0_i32_0 : i32, i32
  }
  func.func @transform_7(%arg0: i32) -> (i32, i32) {
    %c0_i32 = arith.constant 0 : i32
    %c0_i32_0 = arith.constant 0 : i32
    return %arg0, %c0_i32 : i32, i32
  }
}

module attributes {stable_mosaic.version = 11 : i64} {
  func.func @attention_kernel(%arg0: i32, %arg1: i32, %arg2: memref<1x8x32xf32, #tpu.memory_space<vmem>>, %arg3: memref<1x8x32xf32, #tpu.memory_space<vmem>>, %arg4: memref<1x1x8xf32, #tpu.memory_space<vmem>>, %arg5: memref<32x32xbf16, #tpu.memory_space<vmem>>, %arg6: memref<32x32xbf16, #tpu.memory_space<vmem>>, %arg7: memref<32x32xbf16, #tpu.memory_space<vmem>>, %arg8: memref<1x32xf32, #tpu.memory_space<vmem>>, %arg9: memref<1x32xf32, #tpu.memory_space<vmem>>, %arg10: memref<1x32xf32, #tpu.memory_space<vmem>>, %arg11: memref<32x32xbf16, #tpu.memory_space<vmem>>, %arg12: memref<1x32xf32, #tpu.memory_space<vmem>>, %arg13: memref<1x32xf32, #tpu.memory_space<vmem>>, %arg14: memref<1x32xf32, #tpu.memory_space<vmem>>, %arg15: memref<1x8x32xf32, #tpu.memory_space<vmem>>) attributes {dimension_semantics = [#tpu.dimension_semantics<parallel>, #tpu.dimension_semantics<parallel>], iteration_bounds = array<i64: 2, 1>, scalar_prefetch = 0 : i64, scratch_operands = 0 : i64, tpu.core_type = #tpu.core_type<tc>, window_params = [{transform_indices = @transform_0, window_bounds = array<i64: 1, 8, 32>}, {transform_indices = @transform_1, window_bounds = array<i64: 1, 8, 32>}, {transform_indices = @transform_2, window_bounds = array<i64: 1, 1, 8>}, {pipeline_mode = #tpu.pipeline_mode<synchronous>, transform_indices = @transform_3, window_bounds = array<i64: 32, 32>}, {pipeline_mode = #tpu.pipeline_mode<synchronous>, transform_indices = @transform_4, window_bounds = array<i64: 32, 32>}, {pipeline_mode = #tpu.pipeline_mode<synchronous>, transform_indices = @transform_5, window_bounds = array<i64: 32, 32>}, {pipeline_mode = #tpu.pipeline_mode<synchronous>, transform_indices = @transform_6, window_bounds = array<i64: 1, 32>}, {pipeline_mode = #tpu.pipeline_mode<synchronous>, transform_indices = @transform_7, window_bounds = array<i64: 1, 32>}, {pipeline_mode = #tpu.pipeline_mode<synchronous>, transform_indices = @transform_8, window_bounds = array<i64: 1, 32>}, {pipeline_mode = #tpu.pipeline_mode<synchronous>, transform_indices = @transform_9, window_bounds = array<i64: 32, 32>}, {pipeline_mode = #tpu.pipeline_mode<synchronous>, transform_indices = @transform_10, window_bounds = array<i64: 1, 32>}, {pipeline_mode = #tpu.pipeline_mode<synchronous>, transform_indices = @transform_11, window_bounds = array<i64: 1, 32>}, {pipeline_mode = #tpu.pipeline_mode<synchronous>, transform_indices = @transform_12, window_bounds = array<i64: 1, 32>}, {transform_indices = @transform_13, window_bounds = array<i64: 1, 8, 32>}]} {
    %c0 = arith.constant 0 : index
    %c0_0 = arith.constant 0 : index
    %c0_1 = arith.constant 0 : index
    %0 = vector.load %arg2[%c0, %c0_0, %c0_1] : memref<1x8x32xf32, #tpu.memory_space<vmem>>, vector<1x8x32xf32>
    %1 = vector.shape_cast %0 : vector<1x8x32xf32> to vector<8x32xf32>
    %c0_2 = arith.constant 0 : index
    %c0_3 = arith.constant 0 : index
    %c0_4 = arith.constant 0 : index
    %2 = vector.load %arg3[%c0_2, %c0_3, %c0_4] : memref<1x8x32xf32, #tpu.memory_space<vmem>>, vector<1x8x32xf32>
    %3 = vector.shape_cast %2 : vector<1x8x32xf32> to vector<8x32xf32>
    %c0_5 = arith.constant 0 : index
    %c0_6 = arith.constant 0 : index
    %c0_7 = arith.constant 0 : index
    %4 = vector.load %arg4[%c0_5, %c0_6, %c0_7] : memref<1x1x8xf32, #tpu.memory_space<vmem>>, vector<1x1x8xf32>
    %5 = vector.shape_cast %4 : vector<1x1x8xf32> to vector<1x8xf32>
    %6 = arith.truncf %1 : vector<8x32xf32> to vector<8x32xbf16>
    %7 = arith.truncf %3 : vector<8x32xf32> to vector<8x32xbf16>
    %c0_8 = arith.constant 0 : index
    %c0_9 = arith.constant 0 : index
    %8 = vector.load %arg5[%c0_8, %c0_9] : memref<32x32xbf16, #tpu.memory_space<vmem>>, vector<32x32xbf16>
    %cst = arith.constant dense<0.000000e+00> : vector<8x32xf32>
    %9 = tpu.matmul %6, %8, %cst {dimension_numbers = #tpu.dot_dimension_numbers<[1], [0], [0], [1], [0, 0, 1, 1], [], []>} : vector<8x32xbf16>, vector<32x32xbf16>, vector<8x32xf32> -> vector<8x32xf32>
    %c0_10 = arith.constant 0 : index
    %c0_11 = arith.constant 0 : index
    %10 = vector.load %arg8[%c0_10, %c0_11] : memref<1x32xf32, #tpu.memory_space<vmem>>, vector<1x32xf32>
    %11 = vector.broadcast %10 : vector<1x32xf32> to vector<8x32xf32>
    %12 = arith.addf %9, %11 : vector<8x32xf32>
    %cst_12 = arith.constant 0.353553385 : f32
    %13 = vector.broadcast %cst_12 : f32 to vector<8x32xf32>
    %14 = arith.mulf %12, %13 : vector<8x32xf32>
    %15 = arith.truncf %14 : vector<8x32xf32> to vector<8x32xbf16>
    %c0_13 = arith.constant 0 : index
    %c0_14 = arith.constant 0 : index
    %16 = vector.load %arg6[%c0_13, %c0_14] : memref<32x32xbf16, #tpu.memory_space<vmem>>, vector<32x32xbf16>
    %cst_15 = arith.constant dense<0.000000e+00> : vector<8x32xf32>
    %17 = tpu.matmul %7, %16, %cst_15 {dimension_numbers = #tpu.dot_dimension_numbers<[1], [0], [0], [1], [0, 0, 1, 1], [], []>} : vector<8x32xbf16>, vector<32x32xbf16>, vector<8x32xf32> -> vector<8x32xf32>
    %c0_16 = arith.constant 0 : index
    %c0_17 = arith.constant 0 : index
    %18 = vector.load %arg9[%c0_16, %c0_17] : memref<1x32xf32, #tpu.memory_space<vmem>>, vector<1x32xf32>
    %19 = vector.broadcast %18 : vector<1x32xf32> to vector<8x32xf32>
    %20 = arith.addf %17, %19 : vector<8x32xf32>
    %21 = arith.truncf %20 : vector<8x32xf32> to vector<8x32xbf16>
    %c0_18 = arith.constant 0 : index
    %c0_19 = arith.constant 0 : index
    %22 = vector.load %arg7[%c0_18, %c0_19] : memref<32x32xbf16, #tpu.memory_space<vmem>>, vector<32x32xbf16>
    %cst_20 = arith.constant dense<0.000000e+00> : vector<8x32xf32>
    %23 = tpu.matmul %7, %22, %cst_20 {dimension_numbers = #tpu.dot_dimension_numbers<[1], [0], [0], [1], [0, 0, 1, 1], [], []>} : vector<8x32xbf16>, vector<32x32xbf16>, vector<8x32xf32> -> vector<8x32xf32>
    %c0_21 = arith.constant 0 : index
    %c0_22 = arith.constant 0 : index
    %24 = vector.load %arg10[%c0_21, %c0_22] : memref<1x32xf32, #tpu.memory_space<vmem>>, vector<1x32xf32>
    %25 = vector.broadcast %24 : vector<1x32xf32> to vector<8x32xf32>
    %26 = arith.addf %23, %25 : vector<8x32xf32>
    %27 = arith.truncf %26 : vector<8x32xf32> to vector<8x32xbf16>
    %28 = vector.shape_cast %5 : vector<1x8xf32> to vector<1x8xf32>
    %29 = vector.broadcast %28 : vector<1x8xf32> to vector<8x8xf32>
    %cst_23 = arith.constant 0.000000e+00 : f32
    %30 = vector.broadcast %cst_23 : f32 to vector<8x32xf32>
    %31 = vector.extract_strided_slice %15 {offsets = [0, 0], sizes = [8, 8], strides = [1, 1]} : vector<8x32xbf16> to vector<8x8xbf16>
    %32 = vector.extract_strided_slice %21 {offsets = [0, 0], sizes = [8, 8], strides = [1, 1]} : vector<8x32xbf16> to vector<8x8xbf16>
    %cst_24 = arith.constant dense<0.000000e+00> : vector<8x8xf32>
    %33 = tpu.matmul %31, %32, %cst_24 {dimension_numbers = #tpu.dot_dimension_numbers<[1], [1], [0], [0], [0, 0, 1, 0], [], []>} : vector<8x8xbf16>, vector<8x8xbf16>, vector<8x8xf32> -> vector<8x8xf32>
    %34 = arith.addf %33, %29 : vector<8x8xf32>
    %cst_25 = arith.constant dense<0xFF800000> : vector<8xf32>
    %35 = vector.multi_reduction <maximumf>, %34, %cst_25 [1] : vector<8x8xf32> to vector<8xf32>
    %36 = vector.shape_cast %35 : vector<8xf32> to vector<8x1xf32>
    %37 = vector.broadcast %36 : vector<8x1xf32> to vector<8x8xf32>
    %38 = arith.subf %34, %37 : vector<8x8xf32>
    %39 = math.exp %38 : vector<8x8xf32>
    %cst_26 = arith.constant dense<0.000000e+00> : vector<8xf32>
    %40 = vector.multi_reduction <add>, %39, %cst_26 [1] : vector<8x8xf32> to vector<8xf32>
    %41 = vector.shape_cast %40 : vector<8xf32> to vector<8x1xf32>
    %42 = tpu.reciprocal %41 {approx = true} : vector<8x1xf32> -> vector<8x1xf32>
    %43 = vector.broadcast %42 : vector<8x1xf32> to vector<8x8xf32>
    %44 = arith.mulf %39, %43 : vector<8x8xf32>
    %45 = arith.truncf %44 : vector<8x8xf32> to vector<8x8xbf16>
    %46 = vector.extract_strided_slice %27 {offsets = [0, 0], sizes = [8, 8], strides = [1, 1]} : vector<8x32xbf16> to vector<8x8xbf16>
    %cst_27 = arith.constant dense<0.000000e+00> : vector<8x8xf32>
    %47 = tpu.matmul %45, %46, %cst_27 {dimension_numbers = #tpu.dot_dimension_numbers<[1], [0], [0], [1], [0, 0, 1, 1], [], []>} : vector<8x8xbf16>, vector<8x8xbf16>, vector<8x8xf32> -> vector<8x8xf32>
    %48 = arith.truncf %47 : vector<8x8xf32> to vector<8x8xbf16>
    %c0_28 = arith.constant 0 : index
    %c0_29 = arith.constant 0 : index
    %49 = vector.load %arg11[%c0_28, %c0_29] : memref<32x32xbf16, #tpu.memory_space<vmem>>, vector<8x32xbf16>
    %cst_30 = arith.constant dense<0.000000e+00> : vector<8x32xf32>
    %50 = tpu.matmul %48, %49, %cst_30 {dimension_numbers = #tpu.dot_dimension_numbers<[1], [0], [0], [1], [0, 0, 1, 1], [], []>} : vector<8x8xbf16>, vector<8x32xbf16>, vector<8x32xf32> -> vector<8x32xf32>
    %51 = arith.addf %30, %50 : vector<8x32xf32>
    %52 = vector.extract_strided_slice %15 {offsets = [0, 8], sizes = [8, 8], strides = [1, 1]} : vector<8x32xbf16> to vector<8x8xbf16>
    %53 = vector.extract_strided_slice %21 {offsets = [0, 8], sizes = [8, 8], strides = [1, 1]} : vector<8x32xbf16> to vector<8x8xbf16>
    %cst_31 = arith.constant dense<0.000000e+00> : vector<8x8xf32>
    %54 = tpu.matmul %52, %53, %cst_31 {dimension_numbers = #tpu.dot_dimension_numbers<[1], [1], [0], [0], [0, 0, 1, 0], [], []>} : vector<8x8xbf16>, vector<8x8xbf16>, vector<8x8xf32> -> vector<8x8xf32>
    %55 = arith.addf %54, %29 : vector<8x8xf32>
    %cst_32 = arith.constant dense<0xFF800000> : vector<8xf32>
    %56 = vector.multi_reduction <maximumf>, %55, %cst_32 [1] : vector<8x8xf32> to vector<8xf32>
    %57 = vector.shape_cast %56 : vector<8xf32> to vector<8x1xf32>
    %58 = vector.broadcast %57 : vector<8x1xf32> to vector<8x8xf32>
    %59 = arith.subf %55, %58 : vector<8x8xf32>
    %60 = math.exp %59 : vector<8x8xf32>
    %cst_33 = arith.constant dense<0.000000e+00> : vector<8xf32>
    %61 = vector.multi_reduction <add>, %60, %cst_33 [1] : vector<8x8xf32> to vector<8xf32>
    %62 = vector.shape_cast %61 : vector<8xf32> to vector<8x1xf32>
    %63 = tpu.reciprocal %62 {approx = true} : vector<8x1xf32> -> vector<8x1xf32>
    %64 = vector.broadcast %63 : vector<8x1xf32> to vector<8x8xf32>
    %65 = arith.mulf %60, %64 : vector<8x8xf32>
    %66 = arith.truncf %65 : vector<8x8xf32> to vector<8x8xbf16>
    %67 = vector.extract_strided_slice %27 {offsets = [0, 8], sizes = [8, 8], strides = [1, 1]} : vector<8x32xbf16> to vector<8x8xbf16>
    %cst_34 = arith.constant dense<0.000000e+00> : vector<8x8xf32>
    %68 = tpu.matmul %66, %67, %cst_34 {dimension_numbers = #tpu.dot_dimension_numbers<[1], [0], [0], [1], [0, 0, 1, 1], [], []>} : vector<8x8xbf16>, vector<8x8xbf16>, vector<8x8xf32> -> vector<8x8xf32>
    %69 = arith.truncf %68 : vector<8x8xf32> to vector<8x8xbf16>
    %c8 = arith.constant 8 : index
    %c0_35 = arith.constant 0 : index
    %70 = vector.load %arg11[%c8, %c0_35] : memref<32x32xbf16, #tpu.memory_space<vmem>>, vector<8x32xbf16>
    %cst_36 = arith.constant dense<0.000000e+00> : vector<8x32xf32>
    %71 = tpu.matmul %69, %70, %cst_36 {dimension_numbers = #tpu.dot_dimension_numbers<[1], [0], [0], [1], [0, 0, 1, 1], [], []>} : vector<8x8xbf16>, vector<8x32xbf16>, vector<8x32xf32> -> vector<8x32xf32>
    %72 = arith.addf %51, %71 : vector<8x32xf32>
    %73 = vector.extract_strided_slice %15 {offsets = [0, 16], sizes = [8, 8], strides = [1, 1]} : vector<8x32xbf16> to vector<8x8xbf16>
    %74 = vector.extract_strided_slice %21 {offsets = [0, 16], sizes = [8, 8], strides = [1, 1]} : vector<8x32xbf16> to vector<8x8xbf16>
    %cst_37 = arith.constant dense<0.000000e+00> : vector<8x8xf32>
    %75 = tpu.matmul %73, %74, %cst_37 {dimension_numbers = #tpu.dot_dimension_numbers<[1], [1], [0], [0], [0, 0, 1, 0], [], []>} : vector<8x8xbf16>, vector<8x8xbf16>, vector<8x8xf32> -> vector<8x8xf32>
    %76 = arith.addf %75, %29 : vector<8x8xf32>
    %cst_38 = arith.constant dense<0xFF800000> : vector<8xf32>
    %77 = vector.multi_reduction <maximumf>, %76, %cst_38 [1] : vector<8x8xf32> to vector<8xf32>
    %78 = vector.shape_cast %77 : vector<8xf32> to vector<8x1xf32>
    %79 = vector.broadcast %78 : vector<8x1xf32> to vector<8x8xf32>
    %80 = arith.subf %76, %79 : vector<8x8xf32>
    %81 = math.exp %80 : vector<8x8xf32>
    %cst_39 = arith.constant dense<0.000000e+00> : vector<8xf32>
    %82 = vector.multi_reduction <add>, %81, %cst_39 [1] : vector<8x8xf32> to vector<8xf32>
    %83 = vector.shape_cast %82 : vector<8xf32> to vector<8x1xf32>
    %84 = tpu.reciprocal %83 {approx = true} : vector<8x1xf32> -> vector<8x1xf32>
    %85 = vector.broadcast %84 : vector<8x1xf32> to vector<8x8xf32>
    %86 = arith.mulf %81, %85 : vector<8x8xf32>
    %87 = arith.truncf %86 : vector<8x8xf32> to vector<8x8xbf16>
    %88 = vector.extract_strided_slice %27 {offsets = [0, 16], sizes = [8, 8], strides = [1, 1]} : vector<8x32xbf16> to vector<8x8xbf16>
    %cst_40 = arith.constant dense<0.000000e+00> : vector<8x8xf32>
    %89 = tpu.matmul %87, %88, %cst_40 {dimension_numbers = #tpu.dot_dimension_numbers<[1], [0], [0], [1], [0, 0, 1, 1], [], []>} : vector<8x8xbf16>, vector<8x8xbf16>, vector<8x8xf32> -> vector<8x8xf32>
    %90 = arith.truncf %89 : vector<8x8xf32> to vector<8x8xbf16>
    %c16 = arith.constant 16 : index
    %c0_41 = arith.constant 0 : index
    %91 = vector.load %arg11[%c16, %c0_41] : memref<32x32xbf16, #tpu.memory_space<vmem>>, vector<8x32xbf16>
    %cst_42 = arith.constant dense<0.000000e+00> : vector<8x32xf32>
    %92 = tpu.matmul %90, %91, %cst_42 {dimension_numbers = #tpu.dot_dimension_numbers<[1], [0], [0], [1], [0, 0, 1, 1], [], []>} : vector<8x8xbf16>, vector<8x32xbf16>, vector<8x32xf32> -> vector<8x32xf32>
    %93 = arith.addf %72, %92 : vector<8x32xf32>
    %94 = vector.extract_strided_slice %15 {offsets = [0, 24], sizes = [8, 8], strides = [1, 1]} : vector<8x32xbf16> to vector<8x8xbf16>
    %95 = vector.extract_strided_slice %21 {offsets = [0, 24], sizes = [8, 8], strides = [1, 1]} : vector<8x32xbf16> to vector<8x8xbf16>
    %cst_43 = arith.constant dense<0.000000e+00> : vector<8x8xf32>
    %96 = tpu.matmul %94, %95, %cst_43 {dimension_numbers = #tpu.dot_dimension_numbers<[1], [1], [0], [0], [0, 0, 1, 0], [], []>} : vector<8x8xbf16>, vector<8x8xbf16>, vector<8x8xf32> -> vector<8x8xf32>
    %97 = arith.addf %96, %29 : vector<8x8xf32>
    %cst_44 = arith.constant dense<0xFF800000> : vector<8xf32>
    %98 = vector.multi_reduction <maximumf>, %97, %cst_44 [1] : vector<8x8xf32> to vector<8xf32>
    %99 = vector.shape_cast %98 : vector<8xf32> to vector<8x1xf32>
    %100 = vector.broadcast %99 : vector<8x1xf32> to vector<8x8xf32>
    %101 = arith.subf %97, %100 : vector<8x8xf32>
    %102 = math.exp %101 : vector<8x8xf32>
    %cst_45 = arith.constant dense<0.000000e+00> : vector<8xf32>
    %103 = vector.multi_reduction <add>, %102, %cst_45 [1] : vector<8x8xf32> to vector<8xf32>
    %104 = vector.shape_cast %103 : vector<8xf32> to vector<8x1xf32>
    %105 = tpu.reciprocal %104 {approx = true} : vector<8x1xf32> -> vector<8x1xf32>
    %106 = vector.broadcast %105 : vector<8x1xf32> to vector<8x8xf32>
    %107 = arith.mulf %102, %106 : vector<8x8xf32>
    %108 = arith.truncf %107 : vector<8x8xf32> to vector<8x8xbf16>
    %109 = vector.extract_strided_slice %27 {offsets = [0, 24], sizes = [8, 8], strides = [1, 1]} : vector<8x32xbf16> to vector<8x8xbf16>
    %cst_46 = arith.constant dense<0.000000e+00> : vector<8x8xf32>
    %110 = tpu.matmul %108, %109, %cst_46 {dimension_numbers = #tpu.dot_dimension_numbers<[1], [0], [0], [1], [0, 0, 1, 1], [], []>} : vector<8x8xbf16>, vector<8x8xbf16>, vector<8x8xf32> -> vector<8x8xf32>
    %111 = arith.truncf %110 : vector<8x8xf32> to vector<8x8xbf16>
    %c24 = arith.constant 24 : index
    %c0_47 = arith.constant 0 : index
    %112 = vector.load %arg11[%c24, %c0_47] : memref<32x32xbf16, #tpu.memory_space<vmem>>, vector<8x32xbf16>
    %cst_48 = arith.constant dense<0.000000e+00> : vector<8x32xf32>
    %113 = tpu.matmul %111, %112, %cst_48 {dimension_numbers = #tpu.dot_dimension_numbers<[1], [0], [0], [1], [0, 0, 1, 1], [], []>} : vector<8x8xbf16>, vector<8x32xbf16>, vector<8x32xf32> -> vector<8x32xf32>
    %114 = arith.addf %93, %113 : vector<8x32xf32>
    %c0_49 = arith.constant 0 : index
    %c0_50 = arith.constant 0 : index
    %115 = vector.load %arg12[%c0_49, %c0_50] : memref<1x32xf32, #tpu.memory_space<vmem>>, vector<1x32xf32>
    %116 = vector.broadcast %115 : vector<1x32xf32> to vector<8x32xf32>
    %117 = arith.addf %114, %116 : vector<8x32xf32>
    %118 = arith.addf %1, %117 : vector<8x32xf32>
    %cst_51 = arith.constant dense<0.000000e+00> : vector<8xf32>
    %119 = vector.multi_reduction <add>, %118, %cst_51 [1] : vector<8x32xf32> to vector<8xf32>
    %120 = vector.shape_cast %119 : vector<8xf32> to vector<8x1xf32>
    %cst_52 = arith.constant 3.200000e+01 : f32
    %121 = vector.broadcast %cst_52 : f32 to vector<8x1xf32>
    %122 = arith.divf %120, %121 : vector<8x1xf32>
    %123 = vector.broadcast %122 : vector<8x1xf32> to vector<8x32xf32>
    %124 = arith.subf %118, %123 : vector<8x32xf32>
    %125 = arith.mulf %124, %124 : vector<8x32xf32>
    %cst_53 = arith.constant dense<0.000000e+00> : vector<8xf32>
    %126 = vector.multi_reduction <add>, %125, %cst_53 [1] : vector<8x32xf32> to vector<8xf32>
    %127 = vector.shape_cast %126 : vector<8xf32> to vector<8x1xf32>
    %cst_54 = arith.constant 3.200000e+01 : f32
    %128 = vector.broadcast %cst_54 : f32 to vector<8x1xf32>
    %129 = arith.divf %127, %128 : vector<8x1xf32>
    %130 = vector.broadcast %122 : vector<8x1xf32> to vector<8x32xf32>
    %131 = arith.subf %118, %130 : vector<8x32xf32>
    %cst_55 = arith.constant 9.99999974E-6 : f32
    %132 = vector.broadcast %cst_55 : f32 to vector<8x1xf32>
    %133 = arith.addf %129, %132 : vector<8x1xf32>
    %134 = math.rsqrt %133 : vector<8x1xf32>
    %135 = vector.broadcast %134 : vector<8x1xf32> to vector<8x32xf32>
    %136 = arith.mulf %131, %135 : vector<8x32xf32>
    %c0_56 = arith.constant 0 : index
    %c0_57 = arith.constant 0 : index
    %137 = vector.load %arg13[%c0_56, %c0_57] : memref<1x32xf32, #tpu.memory_space<vmem>>, vector<1x32xf32>
    %138 = vector.broadcast %137 : vector<1x32xf32> to vector<8x32xf32>
    %139 = arith.mulf %136, %138 : vector<8x32xf32>
    %c0_58 = arith.constant 0 : index
    %c0_59 = arith.constant 0 : index
    %140 = vector.load %arg14[%c0_58, %c0_59] : memref<1x32xf32, #tpu.memory_space<vmem>>, vector<1x32xf32>
    %141 = vector.broadcast %140 : vector<1x32xf32> to vector<8x32xf32>
    %142 = arith.addf %139, %141 : vector<8x32xf32>
    %c0_60 = arith.constant 0 : index
    %c0_61 = arith.constant 0 : index
    %c0_62 = arith.constant 0 : index
    %143 = vector.load %arg15[%c0_60, %c0_61, %c0_62] : memref<1x8x32xf32, #tpu.memory_space<vmem>>, vector<1x8x32xf32>
    %144 = vector.shape_cast %143 : vector<1x8x32xf32> to vector<8x32xf32>
    %145 = vector.shape_cast %142 : vector<8x32xf32> to vector<1x8x32xf32>
    tpu.vector_store %arg15[%c0_60, %c0_61, %c0_62], %145 {strides = array<i32>} : memref<1x8x32xf32, #tpu.memory_space<vmem>>, vector<1x8x32xf32>,
    return
  }
  func.func @transform_0(%arg0: i32, %arg1: i32) -> (i32, i32, i32) {
    %c0_i32 = arith.constant 0 : i32
    %c0_i32_0 = arith.constant 0 : i32
    return %arg0, %arg1, %c0_i32 : i32, i32, i32
  }
  func.func @transform_1(%arg0: i32, %arg1: i32) -> (i32, i32, i32) {
    %c0_i32 = arith.constant 0 : i32
    %c0_i32_0 = arith.constant 0 : i32
    %c0_i32_1 = arith.constant 0 : i32
    return %arg0, %c0_i32, %c0_i32_0 : i32, i32, i32
  }
  func.func @transform_2(%arg0: i32, %arg1: i32) -> (i32, i32, i32) {
    %c0_i32 = arith.constant 0 : i32
    %c0_i32_0 = arith.constant 0 : i32
    %c0_i32_1 = arith.constant 0 : i32
    return %arg0, %c0_i32, %c0_i32_0 : i32, i32, i32
  }
  func.func @transform_3(%arg0: i32, %arg1: i32) -> (i32, i32) {
    %c0_i32 = arith.constant 0 : i32
    %c0_i32_0 = arith.constant 0 : i32
    %c0_i32_1 = arith.constant 0 : i32
    return %c0_i32, %c0_i32_0 : i32, i32
  }
  func.func @transform_4(%arg0: i32, %arg1: i32) -> (i32, i32) {
    %c0_i32 = arith.constant 0 : i32
    %c0_i32_0 = arith.constant 0 : i32
    %c0_i32_1 = arith.constant 0 : i32
    return %c0_i32, %c0_i32_0 : i32, i32
  }
  func.func @transform_5(%arg0: i32, %arg1: i32) -> (i32, i32) {
    %c0_i32 = arith.constant 0 : i32
    %c0_i32_0 = arith.constant 0 : i32
    %c0_i32_1 = arith.constant 0 : i32
    return %c0_i32, %c0_i32_0 : i32, i32
  }
  func.func @transform_6(%arg0: i32, %arg1: i32) -> (i32, i32) {
    %c0_i32 = arith.constant 0 : i32
    %c0_i32_0 = arith.constant 0 : i32
    %c0_i32_1 = arith.constant 0 : i32
    return %c0_i32, %c0_i32_0 : i32, i32
  }
  func.func @transform_7(%arg0: i32, %arg1: i32) -> (i32, i32) {
    %c0_i32 = arith.constant 0 : i32
    %c0_i32_0 = arith.constant 0 : i32
    %c0_i32_1 = arith.constant 0 : i32
    return %c0_i32, %c0_i32_0 : i32, i32
  }
  func.func @transform_8(%arg0: i32, %arg1: i32) -> (i32, i32) {
    %c0_i32 = arith.constant 0 : i32
    %c0_i32_0 = arith.constant 0 : i32
    %c0_i32_1 = arith.constant 0 : i32
    return %c0_i32, %c0_i32_0 : i32, i32
  }
  func.func @transform_9(%arg0: i32, %arg1: i32) -> (i32, i32) {
    %c0_i32 = arith.constant 0 : i32
    %c0_i32_0 = arith.constant 0 : i32
    %c0_i32_1 = arith.constant 0 : i32
    return %c0_i32, %c0_i32_0 : i32, i32
  }
  func.func @transform_10(%arg0: i32, %arg1: i32) -> (i32, i32) {
    %c0_i32 = arith.constant 0 : i32
    %c0_i32_0 = arith.constant 0 : i32
    %c0_i32_1 = arith.constant 0 : i32
    return %c0_i32, %c0_i32_0 : i32, i32
  }
  func.func @transform_11(%arg0: i32, %arg1: i32) -> (i32, i32) {
    %c0_i32 = arith.constant 0 : i32
    %c0_i32_0 = arith.constant 0 : i32
    %c0_i32_1 = arith.constant 0 : i32
    return %c0_i32, %c0_i32_0 : i32, i32
  }
  func.func @transform_12(%arg0: i32, %arg1: i32) -> (i32, i32) {
    %c0_i32 = arith.constant 0 : i32
    %c0_i32_0 = arith.constant 0 : i32
    %c0_i32_1 = arith.constant 0 : i32
    return %c0_i32, %c0_i32_0 : i32, i32
  }
  func.func @transform_13(%arg0: i32, %arg1: i32) -> (i32, i32, i32) {
    %c0_i32 = arith.constant 0 : i32
    %c0_i32_0 = arith.constant 0 : i32
    return %arg0, %arg1, %c0_i32 : i32, i32, i32
  }
}

module attributes {stable_mosaic.version = 11 : i64} {
  func.func @classifier_kernel(%arg0: memref<2x32xf32, #tpu.memory_space<vmem>>, %arg1: memref<32x128xbf16, #tpu.memory_space<vmem>>, %arg2: memref<1x128xf32, #tpu.memory_space<vmem>>, %arg3: memref<2x128xf32, #tpu.memory_space<vmem>>) attributes {dimension_semantics = [], scalar_prefetch = 0 : i64, scratch_operands = 0 : i64, tpu.core_type = #tpu.core_type<tc>} {
    %c0 = arith.constant 0 : index
    %c0_0 = arith.constant 0 : index
    %0 = vector.load %arg0[%c0, %c0_0] : memref<2x32xf32, #tpu.memory_space<vmem>>, vector<2x32xf32>
    %1 = arith.truncf %0 : vector<2x32xf32> to vector<2x32xbf16>
    %c0_1 = arith.constant 0 : index
    %c0_2 = arith.constant 0 : index
    %2 = vector.load %arg1[%c0_1, %c0_2] : memref<32x128xbf16, #tpu.memory_space<vmem>>, vector<32x128xbf16>
    %cst = arith.constant dense<0.000000e+00> : vector<2x128xf32>
    %3 = tpu.matmul %1, %2, %cst {dimension_numbers = #tpu.dot_dimension_numbers<[1], [0], [0], [1], [0, 0, 1, 1], [], []>} : vector<2x32xbf16>, vector<32x128xbf16>, vector<2x128xf32> -> vector<2x128xf32>
    %c0_3 = arith.constant 0 : index
    %c0_4 = arith.constant 0 : index
    %4 = vector.load %arg2[%c0_3, %c0_4] : memref<1x128xf32, #tpu.memory_space<vmem>>, vector<1x128xf32>
    %5 = vector.broadcast %4 : vector<1x128xf32> to vector<2x128xf32>
    %6 = arith.addf %3, %5 : vector<2x128xf32>
    %c0_5 = arith.constant 0 : index
    %c0_6 = arith.constant 0 : index
    %7 = vector.load %arg3[%c0_5, %c0_6] : memref<2x128xf32, #tpu.memory_space<vmem>>, vector<2x128xf32>
    tpu.vector_store %arg3[%c0_5, %c0_6], %6 {strides = array<i32>} : memref<2x128xf32, #tpu.memory_space<vmem>>, vector<2x128xf32>,
    return
  }
}

</mosaic_0001>

<bundles_post_ra>
// kernel: distilbert_classifier_forward.9
= control target key start
LH: loop header
LB: loop body
LE: loop exit
PB: predicated region body
PF: predicated region fallthrough
CT: control target
= control target key end

     0   :  { %s147_s0 = inlined_call_operand.vmem [shape: f32[2,32], index: 0, kind: input, shape index: {}]   ;;  %s148_s1 = inlined_call_operand.vmem [shape: bf16[32,128], index: 1, kind: input, shape index: {}]   ;;  %s149_s2 = inlined_call_operand.vmem [shape: f32[1,128], index: 2, kind: input, shape index: {}]   ;;  %s150_s3 = inlined_call_operand.hbm [shape: f32[2,128], index: 3, kind: output, shape index: {}]  }
   0x1   :  { %v82_v0 = vld [vmem:[%s148_s1 + $0x8] sm:$0xff] }
   0x2   :  { %8 = vsyncpa [#allocation3], 0  ;;  %48 = vmatpush.bf16.msra.mxu0 %v82_v0  ;;  %v81_v1 = vld [vmem:[%s148_s1] sm:$0xff]  ;;  %vm38_vm0 = vcmask 261120   ;;  %s111_s20 = smov [#allocation2]   ;;  %s63_s24 = sshll.u32 %s150_s3, 4  ;;  %s64_s24 = int_to_ptr.hbm [resolvable:$true] %s63_s24 }
   0x3   :  { %v16_v2 = vld [vmem:[%s147_s0] sm:$0x3]  ;;  %s61_s21 = sshll.u32 %s111_s20, 4  ;;  %s62_s21 = int_to_ptr.vmem [resolvable:$true] %s61_s21 }
   0x4   :  { %v17_v3 = vpack.c.bf16 %v16_v2, %v16_v2  ;;  %v84_v4 = vld [vmem:[%s149_s2] ss:$0 sm:$0xff] }
   0x6   :  { %49 = vmatpush.bf16.msra.mxu0 %v81_v1 }
   0x9   :  { %80 = vmatmul.msk.bf16.vlgmr.msra.gmra.mxu0 %vm38_vm0, %v17_v3 }
  0x86   :  { %v51_v5 = vpop.f32.mrf.mxu0 }
  0x87   :  { %v52_v6 = vadd.f32 %v84_v4, %v51_v5 }
  0x89   :  { %55 = vst [vmem:[#allocation2] sm:$0x3] %v52_v6 }
  0x8a   :  { %66 = dma.vmem_to_hbm [thread:$0]  %s62_s21, 32, %s64_s24, [#allocation3]  }
  0x8e   :  { %v53_v7 = vpop.f32.mrf.mxu0 }
  0x8f   :  { %109 = dma.done.wait [#allocation3], 32  }
  0x90   :  { %110 = vsyncadd [#allocation3], 4294967264 }
  0x91   :  { %71 = vsyncpa [#allocation3], 1 }

// kernel: distilbert_classifier_forward.6
= control target key start
LH: loop header
LB: loop body
LE: loop exit
PB: predicated region body
PF: predicated region fallthrough
CT: control target
= control target key end

     0   :  { %vm50_vm0 = vcmask 261120   ;;  %v286_v30 = vmov 32.0   ;;  %s388_s1 = inlined_call_operand.vmem [shape: bf16[32,128], index: 1, kind: input, shape index: {}]   ;;  %s389_s0 = inlined_call_operand.vmem [shape: f32[16,32], index: 0, kind: input, shape index: {}]   ;;  %s390_s3 = inlined_call_operand.vmem [shape: bf16[128,32], index: 3, kind: input, shape index: {}]   ;;  %s391_s2 = inlined_call_operand.vmem [shape: f32[1,128], index: 2, kind: input, shape index: {}]   ;;  %s392_s4 = inlined_call_operand.vmem [shape: f32[1,32], index: 4, kind: input, shape index: {}]   ;;  %s393_s5 = inlined_call_operand.vmem [shape: f32[1,32], index: 5, kind: input, shape index: {}]   ;;  %s394_s6 = inlined_call_operand.vmem [shape: f32[1,32], index: 6, kind: input, shape index: {}]   ;;  %s395_s7 = inlined_call_operand.vmem [shape: f32[16,32], index: 7, kind: output, shape index: {}]  }
   0x1   :  { %v266_v0 = vld [vmem:[%s388_s1 + $0x8] sm:$0xff]  ;;  %v265_v1 = vld [vmem:[%s388_s1] sm:$0xff]  ;;  %v274_v2 = vld [vmem:[%s390_s3 + $0x38] sm:$0xff]  ;;  %280 = vrcp.f32 %v286_v30 }
   0x2   :  { %60 = vmatpush.bf16.msra.mxu0 %v266_v0  ;;  %v27_v3 = vld [vmem:[%s389_s0] sm:$0xff]  ;;  %v28_v4 = vld [vmem:[%s389_s0 + $0x8] sm:$0xff]  ;;  %139 = vmatpush.bf16.msra.mxu1 %v274_v2  ;;  %v273_v5 = vld [vmem:[%s390_s3 + $0x30] sm:$0xff] }
   0x3   :  { %v29_v6 = vpack.c.bf16 %v28_v4, %v27_v3  ;;  %v272_v7 = vld [vmem:[%s390_s3 + $0x28] sm:$0xff]  ;;  %v271_v8 = vld [vmem:[%s390_s3 + $0x20] sm:$0xff]  ;;  %v270_v9 = vld [vmem:[%s390_s3 + $0x18] sm:$0xff] }
   0x4   :  { %v269_v10 = vld [vmem:[%s390_s3 + $0x10] sm:$0xff]  ;;  %v268_v11 = vld [vmem:[%s390_s3 + $0x8] sm:$0xff]  ;;  %v267_v12 = vld [vmem:[%s390_s3] sm:$0xff] }
   0x5   :  { %v276_v14 = vld [vmem:[%s391_s2] ss:$0 sm:$0xff] }
   0x6   :  { %61 = vmatpush.bf16.msra.mxu0 %v265_v1  ;;  %140 = vmatpush.bf16.msra.mxu1 %v273_v5  ;;  %v277_v21 = vld [vmem:[%s392_s4] ss:$0 sm:$0xff] }
   0x7   :  { %v281_v31 = vpop.eup %280  ;;  %v278_v61 = vld [vmem:[%s393_s5] ss:$0 sm:$0xff] }
   0x8   :  { %v162_v32 = vmul.f32 32.0, %v281_v31  ;;  %vm166_vm1 = vweird.f32 %v281_v31  ;;  %v279_v0 = vld [vmem:[%s394_s6] ss:$0 sm:$0xff] }
   0x9   :  { %232 = vmatmul.msk.bf16.vlgmr.msra.gmra.mxu0 %vm50_vm0, %v29_v6 }
   0xa   :  { %141 = vmatpush.bf16.msra.mxu1 %v272_v7  ;;  %v163_v33 = vsub.f32 1.0, %v162_v32 }
   0xc   :  { %v164_v34 = vmul.f32 %v281_v31, %v163_v33 }
   0xe   :  { %142 = vmatpush.bf16.msra.mxu1 %v271_v8  ;;  %v165_v35 = vadd.f32 %v281_v31, %v164_v34 }
  0x10   :  { %v167_v36 = vsel %vm166_vm1, %v281_v31, %v165_v35 }
  0x12   :  { %143 = vmatpush.bf16.msra.mxu1 %v270_v9 }
  0x16   :  { %144 = vmatpush.bf16.msra.mxu1 %v269_v10 }
  0x1a   :  { %145 = vmatpush.bf16.msra.mxu1 %v268_v11 }
  0x1e   :  { %146 = vmatpush.bf16.msra.mxu1 %v267_v12 }
  0x86   :  { %v63_v13 = vpop.f32.mrf.mxu0 }
  0x87   :  { %v64_v15 = vadd.f32 %v276_v14, %v63_v13 }
  0x89   :  { %v68_v18 = vmax.f32 %v64_v15, 0.0 }
  0x8e   :  { %v65_v16 = vpop.f32.mrf.mxu0 }
  0x8f   :  { %v66_v17 = vadd.f32 %v276_v14, %v65_v16 }
  0x91   :  { %v69_v19 = vmax.f32 %v66_v17, 0.0 }
  0x93   :  { %v70_v20 = vpack.c.bf16 %v69_v19, %v68_v18 }
  0x95   :  { %147 = vmatmul.bf16.vlgmr.msra.gmra.mxu1 %v70_v20 }
 0x112   :  { %v148_v22 = vpop.f32.mrf.mxu1 }
 0x113   :  { %v149_v23 = vadd.f32 %v277_v21, %v148_v22 }
 0x115   :  { %v153_v24 = vadd.f32 %v149_v23, %v27_v3 }
 0x117   :  { %v155_v25 = vsel %vm50_vm0, %v153_v24, 0.0 }
 0x118   :  { %156 = vadd.xlane.f32.xlu0 %v155_v25 }
 0x11a   :  { %v150_v26 = vpop.f32.mrf.mxu1 }
 0x11b   :  { %v151_v27 = vadd.f32 %v277_v21, %v150_v26 }
 0x11d   :  { %v154_v28 = vadd.f32 %v151_v27, %v28_v4 }
 0x11f   :  { %v158_v29 = vsel %vm50_vm0, %v154_v28, 0.0 }
 0x120   :  { %159 = vadd.xlane.f32.xlu0 %v158_v29 }
 0x18b   :  { %v157_v37 = vpop.xlane.xlu0 %156 }
 0x18c   :  { %v168_v38 = vmul.f32 %v167_v36, %v157_v37 }
 0x18e   :  { %v170_v39 = vsub.f32 %v153_v24, %v168_v38 }
 0x190   :  { %v172_v40 = vmul.f32 %v170_v39, %v170_v39 }
 0x192   :  { %v174_v41 = vsel %vm50_vm0, %v172_v40, 0.0 }
 0x193   :  { %175 = vadd.xlane.f32.xlu1 %v174_v41  ;;  %v160_v42 = vpop.xlane.xlu0 %159 }
 0x194   :  { %v169_v43 = vmul.f32 %v167_v36, %v160_v42 }
 0x196   :  { %v171_v44 = vsub.f32 %v154_v28, %v169_v43 }
 0x198   :  { %v173_v45 = vmul.f32 %v171_v44, %v171_v44 }
 0x19a   :  { %v177_v46 = vsel %vm50_vm0, %v173_v45, 0.0 }
 0x19b   :  { %178 = vadd.xlane.f32.xlu1 %v177_v46 }
 0x206   :  { %v176_v47 = vpop.xlane.xlu1 %175 }
 0x207   :  { %v180_v48 = vmul.f32 %v176_v47, %v167_v36 }
 0x209   :  { %v182_v49 = vadd.f32 1e-05, %v180_v48 }
 0x20b   :  { %282 = vrsqrt.f32 %v182_v49  ;;  %vm190_vm3 = vweird.f32 %v182_v49 }
 0x20e   :  { %v179_v50 = vpop.xlane.xlu1 %178 }
 0x20f   :  { %v181_v51 = vmul.f32 %v179_v50, %v167_v36 }
 0x211   :  { %v283_v52 = vpop.eup %282  ;;  %v183_v53 = vadd.f32 1e-05, %v181_v51 }
 0x212   :  { %v185_v54 = vmul.f32 %v283_v52, %v182_v49  ;;  %vm191_vm2 = vweird.f32 %v283_v52 }
 0x213   :  { %284 = vrsqrt.f32 %v183_v53  ;;  %vm192_vm4 = vmor %vm190_vm3, %vm191_vm2  ;;  %vm200_vm6 = vweird.f32 %v183_v53 }
 0x214   :  { %v186_v55 = vmul.f32 %v283_v52, %v185_v54 }
 0x216   :  { %v187_v56 = vmul.f32 0.5, %v186_v55 }
 0x218   :  { %v188_v57 = vsub.f32 1.5, %v187_v56 }
 0x219   :  { %v285_v58 = vpop.eup %284 }
 0x21a   :  { %v189_v59 = vmul.f32 %v283_v52, %v188_v57  ;;  %v195_v60 = vmul.f32 %v285_v58, %v183_v53  ;;  %vm201_vm5 = vweird.f32 %v285_v58 }
 0x21b   :  { %vm202_vm7 = vmor %vm200_vm6, %vm201_vm5 }
 0x21c   :  { %v193_v62 = vsel %vm192_vm4, %v283_v52, %v189_v59  ;;  %v196_v63 = vmul.f32 %v285_v58, %v195_v60 }
 0x21d   :  { %v204_v1 = vmul.f32 %v193_v62, %v170_v39 }
 0x21e   :  { %v197_v2 = vmul.f32 0.5, %v196_v63 }
 0x21f   :  { %v210_v3 = vmul.f32 %v278_v61, %v204_v1 }
 0x220   :  { %v198_v4 = vsub.f32 1.5, %v197_v2 }
 0x221   :  { %v216_v5 = vadd.f32 %v279_v0, %v210_v3 }
 0x222   :  { %v199_v6 = vmul.f32 %v285_v58, %v198_v4 }
 0x223   :  { %218 = vst.msk [vmem:[%s395_s7] sm:$0xff] %vm50_vm0, %v216_v5 }
 0x224   :  { %v203_v7 = vsel %vm202_vm7, %v285_v58, %v199_v6 }
 0x225   :  { %v205_v8 = vmul.f32 %v203_v7, %v171_v44 }
 0x227   :  { %v211_v9 = vmul.f32 %v278_v61, %v205_v8 }
 0x229   :  { %v217_v10 = vadd.f32 %v279_v0, %v211_v9 }
 0x22b   :  { %219 = vst.msk [vmem:[%s395_s7 + $0x8] sm:$0xff] %vm50_vm0, %v217_v10 }

// kernel: distilbert_classifier_forward.5
= control target key start
LH: loop header
LB: loop body
LE: loop exit
PB: predicated region body
PF: predicated region fallthrough
CT: control target
= control target key end

     0   :  { %s1281_s25 = smov 0   ;;  %s1283_s26 = smov 0   ;;  %s1435_s0 = inlined_call_operand.vmem [shape: f32[2,8,32], index: 0, kind: input, shape index: {}, may-alias: {0,1}]   ;;  %s1436_s1 = inlined_call_operand.vmem [shape: f32[2,8,32], index: 1, kind: input, shape index: {}, may-alias: {0,1}]   ;;  %s1437_s2 = inlined_call_operand.vmem [shape: f32[2,1,8], index: 2, kind: input, shape index: {}]   ;;  %s1438_s3 = inlined_call_operand.vmem [shape: bf16[32,32], index: 3, kind: input, shape index: {}]   ;;  %s1439_s4 = inlined_call_operand.vmem [shape: bf16[32,32], index: 4, kind: input, shape index: {}]   ;;  %s1440_s5 = inlined_call_operand.vmem [shape: bf16[32,32], index: 5, kind: input, shape index: {}]   ;;  %s1441_s6 = inlined_call_operand.vmem [shape: f32[1,32], index: 6, kind: input, shape index: {}]   ;;  %s1442_s7 = inlined_call_operand.vmem [shape: f32[1,32], index: 7, kind: input, shape index: {}]   ;;  %s1443_s8 = inlined_call_operand.vmem [shape: f32[1,32], index: 8, kind: input, shape index: {}]   ;;  %s1444_s9 = inlined_call_operand.vmem [shape: bf16[32,32], index: 9, kind: input, shape index: {}]   ;;  %s1445_s10 = inlined_call_operand.vmem [shape: f32[1,32], index: 10, kind: input, shape index: {}]   ;;  %s1446_s11 = inlined_call_operand.vmem [shape: f32[1,32], index: 11, kind: input, shape index: {}]   ;;  %s1447_s12 = inlined_call_operand.vmem [shape: f32[1,32], index: 12, kind: input, shape index: {}]   ;;  %s1448_s13 = inlined_call_operand.vmem [shape: f32[2,8,32], index: 13, kind: output, shape index: {}]  }
   0x1   :  { %s1285_s27 = smov 0  }
   0x2 LB: > { %s35_s28 = sadd.s32 1, %s1201_s26  ;;  %p1077_p0 = scmp.ge.s32.totalorder %s1205_s27, 1  ;;  %s1205_s27 = sphi %s1285_s27, %s23_s27   ;;  %s1201_s26 = sphi %s1283_s26, %s1450_s26   ;;  %s1197_s25 = sphi %s1281_s25, %s1449_s25  }
   0x3   : > { %p37_p1 = scmp.ge.s32.totalorder %s35_s28, 2  ;;  %p422_p2 = scmp.lt.s32.totalorder %s1205_s27, 3 }
   0x5   : > { %s1452_s28 = smov (%p37_p1, %s35_s28), 0  ;;  %p423_p3 = pnand %p1077_p0, %p422_p2 }
   0x6   : > { %p477_p4 = scmp.lt.s32.totalorder (!%p423_p3), %s1197_s25, 1  ;;  %s1207_s18 = smov (!%p423_p3), 112  }
   0x7   : > { %426 = sbr.rel (%p423_p3) target bundleno = 1624 (0x658), region = 72  ;;  %s1208_s19 = smov (!%p423_p3), 120  }
   0x8   : > { %s1209_s24 = smov (!%p423_p3), 104  }
   0xc   : > { %v1123_v0 = vld [vmem:[%s1438_s3 + $0x8] sm:$0xff]  ;;  %v1122_v2 = vld [vmem:[%s1438_s3] sm:$0xff]  ;;  %s1454_s25 = smov (!%p477_p4, %s1197_s25), 1  ;;  %vm524_vm0 = vcmask 261120   ;;  %vm617_vm1 = vcmask 64512   ;;  %vm652_vm2 = vcmask 1043456  }
   0xd   : > { %v1125_v1 = vld [vmem:[%s1439_s4 + $0x8] sm:$0xff]  ;;  %534 = vmatpush.bf16.msra.mxu0 %v1123_v0  ;;  %v1124_v3 = vld [vmem:[%s1439_s4] sm:$0xff]  ;;  %s1314_s20 = sshll.u32 %s1454_s25, 3 }
   0xe   : > { %572 = vmatpush.bf16.msra.mxu1 %v1125_v1  ;;  %s483_s23 = scalar_lea.vmem %s1435_s0, %s1314_s20  ;;  %s487_s30 = scalar_lea.vmem %s1436_s1, %s1314_s20  ;;  %v1156_v8 = vld [vmem:[%s1441_s6] ss:$0 sm:$0xff]  ;;  %v1127_v24 = vld [vmem:[%s1440_s5 + $0x8] sm:$0xff] }
   0xf   : > { %v1320_v4 = vld [vmem:[%s483_s23] sm:$0xff]  ;;  %s490_s23 = scalar_lea.vmem %s1437_s2, %s1454_s25  ;;  %606 = vmatpush.bf16.msra.mxu2 %v1127_v24 }
  0x10   : > { %v502_v5 = vpack.c.bf16 %v1320_v4, %v1320_v4  ;;  %v500_v6 = vld [vmem:[%s487_s30] sm:$0xff] }
  0x11   : > { %535 = vmatpush.bf16.msra.mxu0 %v1122_v2  ;;  %v503_v7 = vpack.c.bf16 %v500_v6, %v500_v6  ;;  %v1157_v9 = vld [vmem:[%s1442_s7] ss:$0 sm:$0xff] }
  0x12   : > { %573 = vmatpush.bf16.msra.mxu1 %v1124_v3  ;;  %v1126_v26 = vld [vmem:[%s1440_s5] sm:$0xff] }
  0x13   : > { %607 = vmatpush.bf16.msra.mxu2 %v1126_v26  ;;  %v1357_v31 = vld [vmem:[%s490_s23] ss:$0 sm:$0xff] }
  0x14   : > { %1089 = vmatmul.msk.bf16.vlgmr.msra.gmra.mxu0 %vm524_vm0, %v502_v5  ;;  %v1159_v51 = vld [vmem:[%s1443_s8] ss:$0 sm:$0xff] }
  0x15   : > { %1098 = vmatmul.msk.bf16.vlgmr.msra.gmra.mxu1 %vm524_vm0, %v503_v7  ;;  %v670_v58 = vld [vmem:[%s1444_s9] sm:$0xf] }
  0x16   : > { %1107 = vmatmul.msk.bf16.vlgmr.msra.gmra.mxu2 %vm524_vm0, %v503_v7  ;;  %v761_v59 = vsel %vm652_vm2, %v670_v58, 0 }
  0x91   : > { %v537_v10 = vpop.f32.mrf.mxu0 }
  0x92   : > { %v538_v11 = vadd.f32 %v1156_v8, %v537_v10  ;;  %v575_v12 = vpop.f32.mrf.mxu1 }
  0x93   : > { %v576_v13 = vadd.f32 %v1157_v9, %v575_v12 }
  0x94   : > { %v541_v14 = vmul.f32 0.35355338, %v538_v11 }
  0x95   : > { %v579_v15 = vpack.c.bf16 %v576_v13, %v576_v13 }
  0x96   : > { %v542_v16 = vpack.c.bf16 %v541_v14, %v541_v14 }
  0x97   : > { %v677_v17 = vunpack.c.l.b16 %v579_v15  ;;  %v622_v18 = vsel %vm617_vm1, %v579_v15, 0 }
  0x98   : > { %631 = vmatpush.bf16.xpose.msra.mxu3 %v622_v18  ;;  %v672_v22 = vunpack.c.l.b16 %v542_v16 }
  0x99   : > { %v678_v19 = vpack.c.b16 %v677_v17, %v677_v17  ;;  %v539_v20 = vpop.f32.mrf.mxu0  ;;  %v609_v50 = vpop.f32.mrf.mxu2 }
  0x9a   : > { %v577_v21 = vpop.f32.mrf.mxu1  ;;  %v673_v23 = vpack.c.b16 %v672_v22, %v672_v22  ;;  %v610_v53 = vadd.f32 %v1159_v51, %v609_v50 }
  0x9b   : > { %778 = vrot.lane.b32.xlu2 %v678_v19, %s1207_s18  ;;  %679 = vrot.lane.b32.xlu1 %v678_v19, %s1208_s19 }
  0x9c   : > { %v613_v54 = vpack.c.bf16 %v610_v53, %v610_v53 }
  0x9e   : > { %v654_v55 = vsel %vm652_vm2, %v613_v54, 0  ;;  %v713_v10 = vunpack.c.l.b16 %v613_v54 }
  0x9f   : > { %1108 = vmatmul.msk.bf16.vlgmr.msra.gmra.mxu3 %vm617_vm1, %v542_v16  ;;  %663 = vmatpush.bf16.msrb.mxu0 %v654_v55 }
  0xa0   : > { %v714_v12 = vpack.c.b16 %v713_v10, %v713_v10 }
  0xa1   : > { %v611_v52 = vpop.f32.mrf.mxu2 }
  0xa3   : > { %776 = vrot.lane.b32.xlu2 %v673_v23, %s1207_s18  ;;  %674 = vrot.lane.b32.xlu1 %v673_v23, %s1208_s19 }
  0xa4   : > { %770 = vmatpush.bf16.msra.mxu0 %v761_v59 }
  0xab   : > { %854 = vrot.lane.b32.xlu1 %v673_v23, %s1209_s24 }
  0xf5   : > { %v779_v25 = vpop.permute.xlu2 %778 }
  0xf6   : > { %v784_v29 = vsel %vm617_vm1, %v779_v25, 0 }
  0xfd   : > { %v777_v34 = vpop.permute.xlu2 %776 }
 0x10d   : > { %v680_v27 = vpop.permute.xlu1 %679 }
 0x10e   : > { %v685_v28 = vsel %vm617_vm1, %v680_v27, 0 }
 0x10f   : > { %694 = vmatpush.bf16.xpose.msrb.mxu1 %v685_v28 }
 0x115   : > { %v675_v30 = vpop.permute.xlu1 %674 }
 0x116   : > { %1110 = vmatmul.msk.bf16.vlgmr.msrb.gmra.mxu1 %vm617_vm1, %v675_v30 }
 0x117   : > { %793 = vmatpush.bf16.xpose.msra.mxu1 %v784_v29  ;;  %v737_v29 = vld [vmem:[%s1444_s9 + $0x4] sm:$0xf] }
 0x118   : > { %v742_v30 = vsel %vm652_vm2, %v737_v29, 0 }
 0x119   : > { %751 = vmatpush.bf16.msrb.mxu3 %v742_v30 }
 0x11d   : > { %v855_v61 = vpop.permute.xlu1 %854 }
 0x122   : > { %v633_v32 = vpop.f32.mrf.mxu3 }
 0x123   : > { %v634_v33 = vadd.f32 %v1357_v31, %v633_v32  ;;  %v833_v32 = vld [vmem:[%s1444_s9 + $0x8] sm:$0xf] }
 0x125   : > { %v637_v35 = vsel %vm617_vm1, %v634_v33, -inf }
 0x126   : > { %1114 = vmatmul.msk.bf16.vlgmr.msra.gmra.mxu1 %vm617_vm1, %v777_v34  ;;  %638 = vmax.xlane.f32.xlu0 %v637_v35 }
 0x12a   : > { %v635_v36 = vpop.f32.mrf.mxu3 }
 0x193   : > { %v696_v37 = vpop.f32.mrf.mxu1 }
 0x194   : > { %v697_v38 = vadd.f32 %v1357_v31, %v696_v37 }
 0x196   : > { %v700_v39 = vsel %vm617_vm1, %v697_v38, -inf }
 0x197   : > { %701 = vmax.xlane.f32.xlu2 %v700_v39 }
 0x199   : > { %v639_v40 = vpop.xlane.xlu0 %638 }
 0x19a   : > { %v640_v41 = vsub.f32 %v634_v33, %v639_v40  ;;  %v838_v33 = vsel %vm652_vm2, %v833_v32, 0  ;;  %v1161_v32 = vld [vmem:[%s1446_s11] ss:$0 sm:$0xff] }
 0x19b   : > { %v698_v42 = vpop.f32.mrf.mxu1  ;;  %847 = vmatpush.bf16.msra.mxu3 %v838_v33 }
 0x19c   : > { %v641_v43 = vmul.f32 1.442695, %v640_v41 }
 0x19e   : > { %1163 = vpow2.f32 %v641_v43 }
 0x1a3   : > { %v795_v44 = vpop.f32.mrf.mxu1 }
 0x1a4   : > { %v1164_v45 = vpop.eup %1163  ;;  %v796_v46 = vadd.f32 %v1357_v31, %v795_v44 }
 0x1a5   : > { %v643_v47 = vsel %vm617_vm1, %v1164_v45, 0.0 }
 0x1a6   : > { %644 = vadd.xlane.f32.xlu0 %v643_v47  ;;  %v799_v48 = vsel %vm617_vm1, %v796_v46, -inf }
 0x1a7   : > { %800 = vmax.xlane.f32.xlu1 %v799_v48 }
 0x1ab   : > { %v797_v49 = vpop.f32.mrf.mxu1 }
 0x1ba   : > { %856 = vrot.lane.b32.xlu0 %v678_v19, %s1209_s24 }
 0x20a   : > { %v702_v56 = vpop.xlane.xlu2 %701 }
 0x20b   : > { %v703_v57 = vsub.f32 %v697_v38, %v702_v56 }
 0x20d   : > { %v704_v60 = vmul.f32 1.442695, %v703_v57 }
 0x20f   : > { %1165 = vpow2.f32 %v704_v60 }
 0x215   : > { %v1166_v62 = vpop.eup %1165 }
 0x216   : > { %v706_v63 = vsel %vm617_vm1, %v1166_v62, 0.0 }
 0x217   : > { %707 = vadd.xlane.f32.xlu2 %v706_v63 }
 0x219   : > { %v645_v0 = vpop.xlane.xlu0 %644 }
 0x21a   : > { %1167 = vrcp.f32 %v645_v0  ;;  %v801_v1 = vpop.xlane.xlu1 %800 }
 0x21b   : > { %v802_v2 = vsub.f32 %v796_v46, %v801_v1 }
 0x21d   : > { %v803_v3 = vmul.f32 1.442695, %v802_v2 }
 0x21f   : > { %1169 = vpow2.f32 %v803_v3  ;;  %v1160_v3 = vld [vmem:[%s1445_s10] ss:$0 sm:$0xff] }
 0x220   : > { %v1168_v5 = vpop.eup %1167 }
 0x221   : > { %v647_v6 = vmul.f32 %v1168_v5, %v1164_v45 }
 0x223   : > { %v648_v7 = vpack.c.bf16 %v647_v6, %v647_v6 }
 0x225   : > { %v1170_v8 = vpop.eup %1169  ;;  %1109 = vmatmul.msk.bf16.vlgmr.msrb.gmra.mxu0 %vm617_vm1, %v648_v7 }
 0x226   : > { %v805_v9 = vsel %vm617_vm1, %v1170_v8, 0.0 }
 0x227   : > { %806 = vadd.xlane.f32.xlu1 %v805_v9 }
 0x22c   : > { %v857_v11 = vpop.permute.xlu0 %856 }
 0x22d   : > { %v862_v13 = vsel %vm617_vm1, %v857_v11, 0  ;;  %v1210_v11 = vmov 32.0  }
 0x22e   : > { %871 = vmatpush.bf16.xpose.msrb.mxu0 %v862_v13 }
 0x22f   : > { %715 = vrot.lane.b32.xlu2 %v714_v12, %s1208_s19  ;;  %s497_s19 = scalar_lea.vmem %s1448_s13, %s1314_s20 }
 0x240   : > { %811 = vrot.lane.b32.xlu1 %v714_v12, %s1207_s18 }
 0x28a   : > { %v708_v14 = vpop.xlane.xlu2 %707 }
 0x28b   : > { %1171 = vrcp.f32 %v708_v14 }
 0x291   : > { %v1172_v15 = vpop.eup %1171 }
 0x292   : > { %v710_v16 = vmul.f32 %v1172_v15, %v1166_v62  ;;  %v716_v17 = vpop.permute.xlu2 %715  ;;  %v911_v62 = vld [vmem:[%s1444_s9 + $0xc] sm:$0xf] }
 0x293   : > { %v721_v18 = vsel %vm652_vm2, %v716_v17, 0  ;;  %v916_v63 = vsel %vm652_vm2, %v911_v62, 0 }
 0x294   : > { %730 = vmatpush.bf16.msrb.mxu2 %v721_v18  ;;  %v711_v19 = vpack.c.bf16 %v710_v16, %v710_v16 }
 0x297   : > { %1111 = vmatmul.msk.bf16.vlgmr.msrb.gmra.mxu2 %vm617_vm1, %v711_v19 }
 0x29a   : > { %v807_v22 = vpop.xlane.xlu1 %806 }
 0x29b   : > { %1173 = vrcp.f32 %v807_v22 }
 0x2a1   : > { %v1174_v24 = vpop.eup %1173 }
 0x2a2   : > { %v665_v20 = vpop.f32.mrf.mxu0  ;;  %v809_v25 = vmul.f32 %v1174_v24, %v1170_v8 }
 0x2a3   : > { %v669_v21 = vpack.c.bf16 %v665_v20, %v665_v20 }
 0x2a4   : > { %v810_v28 = vpack.c.bf16 %v809_v25, %v809_v25 }
 0x2a5   : > { %1113 = vmatmul.msk.bf16.vlgmr.msra.gmra.mxu0 %vm617_vm1, %v669_v21 }
 0x2aa   : > { %v667_v23 = vpop.f32.mrf.mxu0 }
 0x2b2   : > { %v812_v26 = vpop.permute.xlu1 %811 }
 0x2b3   : > { %v817_v27 = vsel %vm652_vm2, %v812_v26, 0 }
 0x2b4   : > { %826 = vmatpush.bf16.msra.mxu2 %v817_v27 }
 0x2b5   : > { %1117 = vmatmul.msk.bf16.vlgmr.msrb.gmra.mxu0 %vm617_vm1, %v855_v61 }
 0x2b7   : > { %1115 = vmatmul.msk.bf16.vlgmr.msra.gmra.mxu2 %vm617_vm1, %v810_v28 }
 0x2b8   : > { %925 = vmatpush.bf16.msrb.mxu2 %v916_v63 }
 0x31a   : > { %v732_v34 = vpop.f32.mrf.mxu2 }
 0x31b   : > { %v736_v35 = vpack.c.bf16 %v732_v34, %v732_v34  ;;  %v1162_v34 = vld [vmem:[%s1447_s12] ss:$0 sm:$0xff] }
 0x31d   : > { %1112 = vmatmul.msk.bf16.vlgmr.msrb.gmra.mxu3 %vm617_vm1, %v736_v35 }
 0x322   : > { %v734_v36 = vpop.f32.mrf.mxu2  ;;  %v772_v37 = vpop.f32.mrf.mxu0 }
 0x32a   : > { %v774_v38 = vpop.f32.mrf.mxu0 }
 0x332   : > { %v873_v39 = vpop.f32.mrf.mxu0 }
 0x333   : > { %v874_v40 = vadd.f32 %v1357_v31, %v873_v39 }
 0x335   : > { %v877_v41 = vsel %vm617_vm1, %v874_v40, -inf }
 0x336   : > { %878 = vmax.xlane.f32.xlu0 %v877_v41 }
 0x33a   : > { %v828_v42 = vpop.f32.mrf.mxu2  ;;  %v875_v43 = vpop.f32.mrf.mxu0 }
 0x33b   : > { %v832_v44 = vpack.c.bf16 %v828_v42, %v828_v42 }
 0x33d   : > { %1116 = vmatmul.msk.bf16.vlgmr.msra.gmra.mxu3 %vm617_vm1, %v832_v44 }
 0x342   : > { %v830_v45 = vpop.f32.mrf.mxu2 }
 0x3a0   : > { %v753_v46 = vpop.f32.mrf.mxu3 }
 0x3a1   : > { %v773_v31 = vadd.f32 %v772_v37, %v753_v46 }
 0x3a8   : > { %v755_v47 = vpop.f32.mrf.mxu3 }
 0x3a9   : > { %v879_v48 = vpop.xlane.xlu0 %878 }
 0x3aa   : > { %v880_v49 = vsub.f32 %v874_v40, %v879_v48 }
 0x3ac   : > { %v881_v50 = vmul.f32 1.442695, %v880_v49 }
 0x3ae   : > { %1175 = vpow2.f32 %v881_v50 }
 0x3b4   : > { %v1176_v51 = vpop.eup %1175 }
 0x3b5   : > { %v883_v52 = vsel %vm617_vm1, %v1176_v51, 0.0 }
 0x3b6   : > { %884 = vadd.xlane.f32.xlu0 %v883_v52 }
 0x3c0   : > { %v849_v53 = vpop.f32.mrf.mxu3 }
 0x3c1   : > { %v853_v54 = vadd.f32 %v849_v53, %v773_v31 }
 0x3c8   : > { %v851_v55 = vpop.f32.mrf.mxu3 }
 0x3ca   : > { %889 = vrot.lane.b32.xlu0 %v714_v12, %s1209_s24 }
 0x429   : > { %v885_v56 = vpop.xlane.xlu0 %884 }
 0x42a   : > { %1177 = vrcp.f32 %v885_v56 }
 0x42b   : > { %1179 = vrcp.f32 %v1210_v11 }
 0x430   : > { %v1178_v57 = vpop.eup %1177 }
 0x431   : > { %v887_v58 = vmul.f32 %v1178_v57, %v1176_v51  ;;  %v1180_v12 = vpop.eup %1179 }
 0x432   : > { %v942_v13 = vmul.f32 32.0, %v1180_v12  ;;  %vm946_vm3 = vweird.f32 %v1180_v12 }
 0x433   : > { %v888_v61 = vpack.c.bf16 %v887_v58, %v887_v58 }
 0x434   : > { %v943_v14 = vsub.f32 1.0, %v942_v13 }
 0x436   : > { %v944_v15 = vmul.f32 %v1180_v12, %v943_v14 }
 0x438   : > { %v945_v16 = vadd.f32 %v1180_v12, %v944_v15 }
 0x43a   : > { %v947_v17 = vsel %vm946_vm3, %v1180_v12, %v945_v16 }
 0x43c   : > { %v890_v59 = vpop.permute.xlu0 %889 }
 0x43d   : > { %v895_v60 = vsel %vm652_vm2, %v890_v59, 0 }
 0x43e   : > { %904 = vmatpush.bf16.msrb.mxu1 %v895_v60 }
 0x441   : > { %1118 = vmatmul.msk.bf16.vlgmr.msrb.gmra.mxu1 %vm617_vm1, %v888_v61 }
 0x4be   : > { %v906_v0 = vpop.f32.mrf.mxu1 }
 0x4bf   : > { %v910_v1 = vpack.c.bf16 %v906_v0, %v906_v0 }
 0x4c1   : > { %1119 = vmatmul.msk.bf16.vlgmr.msrb.gmra.mxu2 %vm617_vm1, %v910_v1 }
 0x4c6   : > { %v908_v2 = vpop.f32.mrf.mxu1 }
 0x544   : > { %v927_v5 = vpop.f32.mrf.mxu2 }
 0x545   : > { %v931_v6 = vadd.f32 %v927_v5, %v853_v54 }
 0x547   : > { %v936_v7 = vadd.f32 %v1160_v3, %v931_v6 }
 0x549   : > { %v937_v8 = vadd.f32 %v936_v7, %v1320_v4 }
 0x54b   : > { %v938_v9 = vsel %vm524_vm0, %v937_v8, 0.0 }
 0x54c   : > { %939 = vadd.xlane.f32.xlu2 %v938_v9  ;;  %v929_v10 = vpop.f32.mrf.mxu2 }
 0x5bf   : > { %v940_v18 = vpop.xlane.xlu2 %939 }
 0x5c0   : > { %v948_v19 = vmul.f32 %v947_v17, %v940_v18 }
 0x5c2   : > { %v949_v20 = vsub.f32 %v937_v8, %v948_v19 }
 0x5c4   : > { %v950_v21 = vmul.f32 %v949_v20, %v949_v20 }
 0x5c6   : > { %v951_v22 = vsel %vm524_vm0, %v950_v21, 0.0 }
 0x5c7   : > { %952 = vadd.xlane.f32.xlu1 %v951_v22 }
 0x63a   : > { %v953_v4 = vpop.xlane.xlu1 %952 }
 0x63b   : > { %v954_v23 = vmul.f32 %v953_v4, %v947_v17 }
 0x63d   : > { %v955_v24 = vadd.f32 1e-05, %v954_v23 }
 0x63f   : > { %1181 = vrsqrt.f32 %v955_v24  ;;  %vm962_vm5 = vweird.f32 %v955_v24 }
 0x645   : > { %v1182_v25 = vpop.eup %1181 }
 0x646   : > { %v957_v26 = vmul.f32 %v1182_v25, %v955_v24  ;;  %vm963_vm4 = vweird.f32 %v1182_v25 }
 0x647   : > { %vm964_vm6 = vmor %vm962_vm5, %vm963_vm4 }
 0x648   : > { %v958_v27 = vmul.f32 %v1182_v25, %v957_v26 }
 0x64a   : > { %v959_v28 = vmul.f32 0.5, %v958_v27 }
 0x64c   : > { %v960_v29 = vsub.f32 1.5, %v959_v28 }
 0x64e   : > { %v961_v30 = vmul.f32 %v1182_v25, %v960_v29 }
 0x650   : > { %v965_v33 = vsel %vm964_vm6, %v1182_v25, %v961_v30 }
 0x651   : > { %v966_v35 = vmul.f32 %v965_v33, %v949_v20 }
 0x653   : > { %v971_v36 = vmul.f32 %v1161_v32, %v966_v35 }
 0x655   : > { %v976_v37 = vadd.f32 %v1162_v34, %v971_v36 }
 0x657   : > { %977 = vst.msk [vmem:[%s497_s19] sm:$0xff] %vm524_vm0, %v976_v37 }
 0x658 PF: > { %s23_s27 = sadd.s32 1, %s1205_s27   ;;  %s1449_s25 = smov %s1201_s26 }
 0x659   : > { %p20_p5 = scmp.ge.s32.totalorder %s23_s27, 4   ;;  %s1450_s26 = smov %s1452_s28 }
 0x65b   :  { %22 = sbr.rel (!%p20_p5) target bundleno = 2 (0x2), region = 108 }

</bundles_post_ra>
